<compile_context>
chip_gen: v6e
topology: v6e:2x2x1
jax: 0.10.0
libtpu: 0.0.40
codegen_flags: <defaults>
</compile_context>

<pallas_src>
import jax
import jax.numpy as jnp
from jax.experimental import pallas as pl
from jax.experimental.pallas import tpu as pltpu


# --------------------------------------------------------------------------- kernels


def ffn_kernel_fused(x_ref, w1_ref, b1_ref, w2_ref, b2_ref, o_ref):
    """Whole d_ff resident: both matmuls + residual + LayerNorm in one body."""
    x = x_ref[...]                                  # [TILE, E], input dtype
    xb = x.astype(w1_ref.dtype)                     # bf16 MXU operand

    # conv1 (1x1): [TILE, E] @ [E, d_ff] -> f32, + bias; cast + ReLU in bf16.
    h = jnp.dot(xb, w1_ref[...], preferred_element_type=jnp.float32) + b1_ref[...]
    h = jnp.maximum(h.astype(w2_ref.dtype), 0)

    # conv2 (1x1): [TILE, d_ff] @ [d_ff, E] -> f32, + bias + residual (exact-dtype x).
    z = (jnp.dot(h, w2_ref[...], preferred_element_type=jnp.float32)
         + b2_ref[...] + x.astype(jnp.float32))

    # TODO(synk): dropout is identity here (inference mode); training RNG mask omitted.

    # LayerNorm(E): gamma=1, beta=0, eps=1e-5, biased variance (two-pass, f32).
    mean = jnp.mean(z, axis=-1, keepdims=True)
    zc = z - mean
    var = jnp.mean(zc * zc, axis=-1, keepdims=True)
    o_ref[...] = (zc * jax.lax.rsqrt(var + 1e-5)).astype(o_ref.dtype)


def ffn_kernel_acc(x_ref, w1_ref, b1_ref, w2_ref, b2_ref, o_ref, acc_ref):
    """d_ff tiled on grid axis 1 ("arbitrary"): f32 accumulator + pl.when epilogue."""
    k = pl.program_id(1)

    @pl.when(k == 0)
    def _():
        acc_ref[...] = jnp.zeros_like(acc_ref)

    x = x_ref[...]
    xb = x.astype(w1_ref.dtype)

    h = jnp.dot(xb, w1_ref[...], preferred_element_type=jnp.float32) + b1_ref[...]
    h = jnp.maximum(h.astype(w2_ref.dtype), 0)
    acc_ref[...] += jnp.dot(h, w2_ref[...], preferred_element_type=jnp.float32)

    @pl.when(k == pl.num_programs(1) - 1)
    def _():
        z = acc_ref[...] + b2_ref[...] + x.astype(jnp.float32)
        mean = jnp.mean(z, axis=-1, keepdims=True)
        zc = z - mean
        var = jnp.mean(zc * zc, axis=-1, keepdims=True)
        o_ref[...] = (zc * jax.lax.rsqrt(var + 1e-5)).astype(o_ref.dtype)


# --------------------------------------------------------------------------- planning


def _round_up(n, m):
    return ((n + m - 1) // m) * m


_SINGLE_BUFFER_OK = None


def _probe_kernel(x_ref, o_ref):
    o_ref[...] = x_ref[...] + 1.0


def _single_buffer_supported():
    """Probe whether this JAX/Mosaic build accepts pipeline_mode=pl.Buffered(1).

    The broad except is intentional and only gates this optional optimization; the
    real FFN pallas_call is built exactly once with the detected setting, so genuine
    lowering/shape bugs in the main kernel are never silently swallowed.
    """
    global _SINGLE_BUFFER_OK
    if _SINGLE_BUFFER_OK is None:
        try:
            f = pl.pallas_call(
                _probe_kernel,
                out_shape=jax.ShapeDtypeStruct((16, 128), jnp.float32),
                grid_spec=pltpu.PrefetchScalarGridSpec(
                    num_scalar_prefetch=0,
                    grid=(2,),
                    in_specs=[pl.BlockSpec((8, 128), lambda i: (0, 0),
                                           pipeline_mode=pl.Buffered(1))],
                    out_specs=pl.BlockSpec((8, 128), lambda i: (i, 0)),
                ),
            )
            jax.block_until_ready(f(jnp.zeros((8, 128), jnp.float32)))
            _SINGLE_BUFFER_OK = True
        except Exception:
            _SINGLE_BUFFER_OK = False
    return _SINGLE_BUFFER_OK


def _vmem_budget_bytes():
    """~75% of physical per-core VMEM (96 MiB on v5e/v6e, 48 MiB on v7x)."""
    try:
        cap = int(pltpu.get_tpu_info().vmem_capacity_bytes)
    except Exception:
        cap = 64 << 20          # conservative (v7x-sized) when the query is unavailable
    return max(24 << 20, min(cap * 3 // 4, cap - (8 << 20)))


def _choose_row_tile(n_rows, requested):
    if n_rows <= 128:
        return _round_up(max(n_rows, 8), 8)          # tiny inputs: minimal zero padding
    if n_rows <= 256:
        return _round_up(n_rows, 128)                # full MXU passes / unmasked stores
    # >= 2 row tiles so v7x's two TensorCores both get work; 256-aligned.
    half = _round_up((n_rows + 1) // 2, 256)
    return max(256, min(_round_up(requested, 256), half))


def _plan(N, E, d_ff, x_dtype, w_dtype, out_dtype, requested_row_tile, single_buf_ok):
    """Pick (row_tile, ff_tile, vmem_limit_bytes) from the per-generation budget."""
    rt = _choose_row_tile(N, requested_row_tile)
    budget = _vmem_budget_bytes()
    xi = jnp.dtype(x_dtype).itemsize
    wi = jnp.dtype(w_dtype).itemsize
    oi = jnp.dtype(out_dtype).itemsize
    dff128 = _round_up(d_ff, 128)

    def footprint(ff, wbuf, with_acc):
        return (2 * rt * E * xi                       # x tile (double buffered)
                + 2 * rt * E * oi                     # out tile (double buffered)
                + wbuf * 2 * E * ff * wi              # W1 + W2 slabs
                + wbuf * ff * 4 + 2 * E * 4           # b1 slab + b2 (f32)
                + rt * ff * (4 + wi)                  # h intermediate (f32) + bf16 copy
                + rt * E * wi                         # in-kernel bf16 cast of x
                + (rt * E * 4 if with_acc else 0))    # f32 accumulator scratch

    wbuf_res = 1 if single_buf_ok else 2
    est = footprint(dff128, wbuf_res, False)
    if est <= budget:
        ff_tile = dff128                              # whole d_ff resident (fused path)
    else:
        fixed = footprint(0, 2, True)
        per_ff = 2 * 2 * E * wi + 2 * 4 + rt * (4 + wi)
        ff_tile = (((budget - fixed) // per_ff) // 128 * 128) if budget > fixed else 0
        ff_tile = max(128, min(ff_tile, dff128))
        est = footprint(ff_tile, 2, True)

    vmem_limit = int(min(max(int(est * 1.2) + (2 << 20), 32 << 20), budget + (8 << 20)))
    return rt, ff_tile, vmem_limit


# --------------------------------------------------------------------------- builders


def _build_fused(N_pad, E, dff, rt, out_dtype, vmem_limit, single_buf):
    resident = pl.Buffered(1) if single_buf else None

    def spec(shape, index_map, mode=None):
        if mode is None:
            return pl.BlockSpec(shape, index_map)
        return pl.BlockSpec(shape, index_map, pipeline_mode=mode)

    return pl.pallas_call(
        ffn_kernel_fused,
        out_shape=jax.ShapeDtypeStruct((N_pad, E), out_dtype),
        grid_spec=pltpu.PrefetchScalarGridSpec(
            num_scalar_prefetch=0,
            grid=(N_pad // rt,),
            in_specs=[
                spec((rt, E), lambda i: (i, 0)),                 # x row tile
                spec((E, dff), lambda i: (0, 0), resident),      # W1 (grid-invariant)
                spec((1, dff), lambda i: (0, 0), resident),      # b1
                spec((dff, E), lambda i: (0, 0), resident),      # W2
                spec((1, E), lambda i: (0, 0), resident),        # b2
            ],
            out_specs=pl.BlockSpec((rt, E), lambda i: (i, 0)),
        ),
        compiler_params=pltpu.CompilerParams(
            dimension_semantics=("parallel",),
            vmem_limit_bytes=vmem_limit,
        ),
    )


def _build_acc(N_pad, E, dff_pad, rt, ff_tile, out_dtype, vmem_limit, single_buf):
    b2_mode = pl.Buffered(1) if single_buf else None

    def spec(shape, index_map, mode=None):
        if mode is None:
            return pl.BlockSpec(shape, index_map)
        return pl.BlockSpec(shape, index_map, pipeline_mode=mode)

    return pl.pallas_call(
        ffn_kernel_acc,
        out_shape=jax.ShapeDtypeStruct((N_pad, E), out_dtype),
        grid_spec=pltpu.PrefetchScalarGridSpec(
            num_scalar_prefetch=0,
            grid=(N_pad // rt, dff_pad // ff_tile),
            in_specs=[
                spec((rt, E), lambda i, k: (i, 0)),              # x (resident over k)
                spec((E, ff_tile), lambda i, k: (0, k)),         # W1 slab
                spec((1, ff_tile), lambda i, k: (0, k)),         # b1 slab
                spec((ff_tile, E), lambda i, k: (k, 0)),         # W2 slab
                spec((1, E), lambda i, k: (0, 0), b2_mode),      # b2 (grid-invariant)
            ],
            out_specs=pl.BlockSpec((rt, E), lambda i, k: (i, 0)),
            scratch_shapes=[pltpu.VMEM((rt, E), jnp.float32)],
        ),
        compiler_params=pltpu.CompilerParams(
            dimension_semantics=("parallel", "arbitrary"),
            vmem_limit_bytes=vmem_limit,
        ),
    )


# --------------------------------------------------------------------------- wrapper


def poswise_ffn(x, w1, b1, w2, b2, *, row_tile=512):
    """Position-wise FFN: LayerNorm(relu(x @ w1 + b1) @ w2 + b2 + x).

    x: [B, L, E]; w1: [E, d_ff] (= conv1.weight[:, :, 0].T); b1: [d_ff];
    w2: [d_ff, E] (= conv2.weight[:, :, 0].T); b2: [E].
    """
    B, L, E = x.shape
    d_ff = w1.shape[1]
    N = B * L
    out_dtype = x.dtype

    # bf16 MXU operands for the weights (2x MXU throughput, half the weight traffic).
    w_dtype = jnp.bfloat16 if jnp.dtype(w1.dtype).itemsize > 2 else jnp.dtype(w1.dtype)
    w1 = w1.astype(w_dtype)
    w2 = w2.astype(w_dtype)

    single_buf = _single_buffer_supported()
    rt, ff_tile, vmem_limit = _plan(N, E, d_ff, x.dtype, w_dtype, out_dtype,
                                    row_tile, single_buf)

    N_pad = _round_up(N, rt)
    dff_pad = _round_up(_round_up(d_ff, 128), ff_tile)
    n_ff = dff_pad // ff_tile

    x2d = x.reshape(N, E)
    if N_pad != N:
        x2d = jnp.pad(x2d, ((0, N_pad - N), (0, 0)))
    if dff_pad != d_ff:
        # Zero-padding the d_ff axis is exact: relu(0 + 0) = 0 and the zero-padded
        # rows of W2 contribute nothing.
        w1 = jnp.pad(w1, ((0, 0), (0, dff_pad - d_ff)))
        b1 = jnp.pad(b1, ((0, dff_pad - d_ff),))
        w2 = jnp.pad(w2, ((0, dff_pad - d_ff), (0, 0)))

    b1_2d = b1.reshape(1, dff_pad).astype(jnp.float32)
    b2_2d = b2.reshape(1, E).astype(jnp.float32)

    if n_ff == 1:
        call = _build_fused(N_pad, E, dff_pad, rt, out_dtype, vmem_limit, single_buf)
    else:
        call = _build_acc(N_pad, E, dff_pad, rt, ff_tile, out_dtype, vmem_limit,
                          single_buf)
    out = call(x2d, w1, b1_2d, w2, b2_2d)

    if N_pad != N:
        out = out[:N]
    return out.reshape(B, L, E)


# --------------------------------------------------------------------------- demo


if __name__ == "__main__":
    # Small shapes consistent with the module: [batch, seq_len, embed_dim].
    # E=128 keeps the kernel's last dim lane-dense (full-width stores).
    B, L, E, D_FF = 2, 8, 128, 256

    key = jax.random.PRNGKey(0)
    kx, kw1, kb1, kw2, kb2 = jax.random.split(key, 5)

    x = jax.random.normal(kx, (B, L, E), dtype=jnp.float32)

    # Deterministic param init mimicking Conv1d's U(-1/sqrt(fan_in), 1/sqrt(fan_in)).
    lim1 = 1.0 / (E ** 0.5)
    lim2 = 1.0 / (D_FF ** 0.5)
    w1 = jax.random.uniform(kw1, (E, D_FF), jnp.float32, -lim1, lim1)   # conv1.weight.T
    b1 = jax.random.uniform(kb1, (D_FF,), jnp.float32, -lim1, lim1)     # conv1.bias
    w2 = jax.random.uniform(kw2, (D_FF, E), jnp.float32, -lim2, lim2)   # conv2.weight.T
    b2 = jax.random.uniform(kb2, (E,), jnp.float32, -lim2, lim2)        # conv2.bias

    out = poswise_ffn(x, w1, b1, w2, b2)
    jax.block_until_ready(out)

    # Pure-JAX reference with matched mixed precision (bf16 MXU operands, f32
    # accumulation, f32 residual and LayerNorm) outside Pallas.
    x2d = x.reshape(-1, E)
    w1b = w1.astype(jnp.bfloat16)
    w2b = w2.astype(jnp.bfloat16)
    h_ref = jnp.dot(x2d.astype(jnp.bfloat16), w1b,
                    preferred_element_type=jnp.float32) + b1
    h_ref = jnp.maximum(h_ref.astype(jnp.bfloat16), 0)
    y_ref = jnp.dot(h_ref, w2b, preferred_element_type=jnp.float32) + b2 + x2d
    mu = y_ref.mean(-1, keepdims=True)
    var = ((y_ref - mu) ** 2).mean(-1, keepdims=True)
    ref = ((y_ref - mu) * jax.lax.rsqrt(var + 1e-5)).reshape(B, L, E)

    err = float(jnp.max(jnp.abs(out.astype(jnp.float32) - ref)))
    assert err < 2e-2, err

    print("KERNEL_OK")
</pallas_src>

<mosaic_0001>
module attributes {stable_mosaic.version = 11 : i64} {
  func.func @_probe_kernel(%arg0: i32, %arg1: memref<8x128xf32, #tpu.memory_space<vmem>>, %arg2: memref<8x128xf32, #tpu.memory_space<vmem>>) attributes {dimension_semantics = [#tpu.dimension_semantics<arbitrary>], iteration_bounds = array<i64: 2>, scalar_prefetch = 0 : i64, scratch_operands = 0 : i64, tpu.core_type = #tpu.core_type<tc>, window_params = [{pipeline_mode = #tpu.pipeline_mode<synchronous>, transform_indices = @transform_0, window_bounds = array<i64: 8, 128>}, {transform_indices = @transform_1, window_bounds = array<i64: 8, 128>}]} {
    %c0 = arith.constant 0 : index
    %c0_0 = arith.constant 0 : index
    %0 = vector.load %arg1[%c0, %c0_0] : memref<8x128xf32, #tpu.memory_space<vmem>>, vector<8x128xf32>
    %cst = arith.constant 1.000000e+00 : f32
    %1 = vector.broadcast %cst : f32 to vector<8x128xf32>
    %2 = arith.addf %0, %1 : vector<8x128xf32>
    %c0_1 = arith.constant 0 : index
    %c0_2 = arith.constant 0 : index
    %3 = vector.load %arg2[%c0_1, %c0_2] : memref<8x128xf32, #tpu.memory_space<vmem>>, vector<8x128xf32>
    tpu.vector_store %arg2[%c0_1, %c0_2], %2 {strides = array<i32>} : memref<8x128xf32, #tpu.memory_space<vmem>>, vector<8x128xf32>,
    return
  }
  func.func @transform_0(%arg0: i32) -> (i32, i32) {
    %c0_i32 = arith.constant 0 : i32
    %c0_i32_0 = arith.constant 0 : i32
    %c0_i32_1 = arith.constant 0 : i32
    return %c0_i32, %c0_i32_0 : i32, i32
  }
  func.func @transform_1(%arg0: i32) -> (i32, i32) {
    %c0_i32 = arith.constant 0 : i32
    %c0_i32_0 = arith.constant 0 : i32
    return %arg0, %c0_i32 : i32, i32
  }
}

module attributes {stable_mosaic.version = 11 : i64} {
  func.func @ffn_kernel_fused(%arg0: i32, %arg1: memref<16x128xf32, #tpu.memory_space<vmem>>, %arg2: memref<128x256xbf16, #tpu.memory_space<vmem>>, %arg3: memref<1x256xf32, #tpu.memory_space<vmem>>, %arg4: memref<256x128xbf16, #tpu.memory_space<vmem>>, %arg5: memref<1x128xf32, #tpu.memory_space<vmem>>, %arg6: memref<16x128xf32, #tpu.memory_space<vmem>>) attributes {dimension_semantics = [#tpu.dimension_semantics<parallel>], iteration_bounds = array<i64: 1>, scalar_prefetch = 0 : i64, scratch_operands = 0 : i64, tpu.core_type = #tpu.core_type<tc>, window_params = [{transform_indices = @transform_0, window_bounds = array<i64: 16, 128>}, {pipeline_mode = #tpu.pipeline_mode<synchronous>, transform_indices = @transform_1, window_bounds = array<i64: 128, 256>}, {pipeline_mode = #tpu.pipeline_mode<synchronous>, transform_indices = @transform_2, window_bounds = array<i64: 1, 256>}, {pipeline_mode = #tpu.pipeline_mode<synchronous>, transform_indices = @transform_3, window_bounds = array<i64: 256, 128>}, {pipeline_mode = #tpu.pipeline_mode<synchronous>, transform_indices = @transform_4, window_bounds = array<i64: 1, 128>}, {transform_indices = @transform_5, window_bounds = array<i64: 16, 128>}]} {
    %c0 = arith.constant 0 : index
    %c0_0 = arith.constant 0 : index
    %0 = vector.load %arg1[%c0, %c0_0] : memref<16x128xf32, #tpu.memory_space<vmem>>, vector<16x128xf32>
    %1 = arith.truncf %0 : vector<16x128xf32> to vector<16x128xbf16>
    %c0_1 = arith.constant 0 : index
    %c0_2 = arith.constant 0 : index
    %2 = vector.load %arg2[%c0_1, %c0_2] : memref<128x256xbf16, #tpu.memory_space<vmem>>, vector<128x256xbf16>
    %cst = arith.constant dense<0.000000e+00> : vector<16x256xf32>
    %3 = tpu.matmul %1, %2, %cst {dimension_numbers = #tpu.dot_dimension_numbers<[1], [0], [0], [1], [0, 0, 1, 1], [], []>} : vector<16x128xbf16>, vector<128x256xbf16>, vector<16x256xf32> -> vector<16x256xf32>
    %c0_3 = arith.constant 0 : index
    %c0_4 = arith.constant 0 : index
    %4 = vector.load %arg3[%c0_3, %c0_4] : memref<1x256xf32, #tpu.memory_space<vmem>>, vector<1x256xf32>
    %5 = vector.broadcast %4 : vector<1x256xf32> to vector<16x256xf32>
    %6 = arith.addf %3, %5 : vector<16x256xf32>
    %7 = arith.truncf %6 : vector<16x256xf32> to vector<16x256xbf16>
    %cst_5 = arith.constant 0.000000e+00 : bf16
    %8 = vector.broadcast %cst_5 : bf16 to vector<16x256xbf16>
    %9 = arith.maximumf %7, %8 : vector<16x256xbf16>
    %c0_6 = arith.constant 0 : index
    %c0_7 = arith.constant 0 : index
    %10 = vector.load %arg4[%c0_6, %c0_7] : memref<256x128xbf16, #tpu.memory_space<vmem>>, vector<256x128xbf16>
    %cst_8 = arith.constant dense<0.000000e+00> : vector<16x128xf32>
    %11 = tpu.matmul %9, %10, %cst_8 {dimension_numbers = #tpu.dot_dimension_numbers<[1], [0], [0], [1], [0, 0, 1, 1], [], []>} : vector<16x256xbf16>, vector<256x128xbf16>, vector<16x128xf32> -> vector<16x128xf32>
    %c0_9 = arith.constant 0 : index
    %c0_10 = arith.constant 0 : index
    %12 = vector.load %arg5[%c0_9, %c0_10] : memref<1x128xf32, #tpu.memory_space<vmem>>, vector<1x128xf32>
    %13 = vector.broadcast %12 : vector<1x128xf32> to vector<16x128xf32>
    %14 = arith.addf %11, %13 : vector<16x128xf32>
    %15 = arith.addf %14, %0 : vector<16x128xf32>
    %cst_11 = arith.constant dense<0.000000e+00> : vector<16xf32>
    %16 = vector.multi_reduction <add>, %15, %cst_11 [1] : vector<16x128xf32> to vector<16xf32>
    %17 = vector.shape_cast %16 : vector<16xf32> to vector<16x1xf32>
    %cst_12 = arith.constant 1.280000e+02 : f32
    %18 = vector.broadcast %cst_12 : f32 to vector<16x1xf32>
    %19 = arith.divf %17, %18 : vector<16x1xf32>
    %20 = vector.broadcast %19 : vector<16x1xf32> to vector<16x128xf32>
    %21 = arith.subf %15, %20 : vector<16x128xf32>
    %22 = arith.mulf %21, %21 : vector<16x128xf32>
    %cst_13 = arith.constant dense<0.000000e+00> : vector<16xf32>
    %23 = vector.multi_reduction <add>, %22, %cst_13 [1] : vector<16x128xf32> to vector<16xf32>
    %24 = vector.shape_cast %23 : vector<16xf32> to vector<16x1xf32>
    %cst_14 = arith.constant 1.280000e+02 : f32
    %25 = vector.broadcast %cst_14 : f32 to vector<16x1xf32>
    %26 = arith.divf %24, %25 : vector<16x1xf32>
    %cst_15 = arith.constant 9.99999974E-6 : f32
    %27 = vector.broadcast %cst_15 : f32 to vector<16x1xf32>
    %28 = arith.addf %26, %27 : vector<16x1xf32>
    %29 = math.rsqrt %28 : vector<16x1xf32>
    %30 = vector.broadcast %29 : vector<16x1xf32> to vector<16x128xf32>
    %31 = arith.mulf %21, %30 : vector<16x128xf32>
    %c0_16 = arith.constant 0 : index
    %c0_17 = arith.constant 0 : index
    %32 = vector.load %arg6[%c0_16, %c0_17] : memref<16x128xf32, #tpu.memory_space<vmem>>, vector<16x128xf32>
    tpu.vector_store %arg6[%c0_16, %c0_17], %31 {strides = array<i32>} : memref<16x128xf32, #tpu.memory_space<vmem>>, vector<16x128xf32>,
    return
  }
  func.func @transform_0(%arg0: i32) -> (i32, i32) {
    %c0_i32 = arith.constant 0 : i32
    %c0_i32_0 = arith.constant 0 : i32
    return %arg0, %c0_i32 : i32, i32
  }
  func.func @transform_1(%arg0: i32) -> (i32, i32) {
    %c0_i32 = arith.constant 0 : i32
    %c0_i32_0 = arith.constant 0 : i32
    %c0_i32_1 = arith.constant 0 : i32
    return %c0_i32, %c0_i32_0 : i32, i32
  }
  func.func @transform_2(%arg0: i32) -> (i32, i32) {
    %c0_i32 = arith.constant 0 : i32
    %c0_i32_0 = arith.constant 0 : i32
    %c0_i32_1 = arith.constant 0 : i32
    return %c0_i32, %c0_i32_0 : i32, i32
  }
  func.func @transform_3(%arg0: i32) -> (i32, i32) {
    %c0_i32 = arith.constant 0 : i32
    %c0_i32_0 = arith.constant 0 : i32
    %c0_i32_1 = arith.constant 0 : i32
    return %c0_i32, %c0_i32_0 : i32, i32
  }
  func.func @transform_4(%arg0: i32) -> (i32, i32) {
    %c0_i32 = arith.constant 0 : i32
    %c0_i32_0 = arith.constant 0 : i32
    %c0_i32_1 = arith.constant 0 : i32
    return %c0_i32, %c0_i32_0 : i32, i32
  }
  func.func @transform_5(%arg0: i32) -> (i32, i32) {
    %c0_i32 = arith.constant 0 : i32
    %c0_i32_0 = arith.constant 0 : i32
    return %arg0, %c0_i32 : i32, i32
  }
}

</mosaic_0001>

<bundles_post_ra>
// kernel: tpu_custom_call.1
= control target key start
LH: loop header
LB: loop body
LE: loop exit
PB: predicated region body
PF: predicated region fallthrough
CT: control target
= control target key end

     0   :  { %6 = vsyncpa [#allocation3], 0  ;;  %s448_s0 = inlined_call_operand.hbm [shape: f32[8,128], index: 0, kind: input, shape index: {}]   ;;  %s449_s1 = inlined_call_operand.hbm [shape: f32[16,128], index: 1, kind: output, shape index: {}]  }
   0x1   :  { %7 = vsyncpa [#allocation4], 0 }
   0x2   :  { %9 = vsyncpa [#allocation4 + $0x1], 0  ;;  %s348_s6 = smov 0   ;;  %s350_s7 = smov 0  }
   0x3   :  { %s352_s8 = smov 0   ;;  %s354_s9 = smov 0  }
   0x4 LB: > { %s369_s10 = sadd.s32 4294967295, %s334_s9   ;;  %s184_s11 = sadd.s32 4294967294, %s334_s9   ;;  %s334_s9 = sphi %s354_s9, %s457_s9   ;;  %s330_s8 = sphi %s352_s8, %s456_s8   ;;  %s326_s7 = sphi %s350_s7, %s455_s7   ;;  %s322_s6 = sphi %s348_s6, %s454_s6  }
   0x5   : > { %s373_s12 = sadd.s32 1, %s334_s9   ;;  %s43_s13 = sadd.s32 1, %s330_s8 }
   0x6   : > { %s40_s14 = ssub.s32 %s334_s9, %s373_s12  ;;  %p53_p0 = scmp.ne.s32.totalorder %s330_s8, %s326_s7 }
   0x7   : > { %p41_p1 = scmp.eq.s32.totalorder %s40_s14, 0  ;;  %p54_p2 = scmp.eq.s32.totalorder %s369_s10, 1 }
   0x8   : > { %p59_p3 = scmp.ne.s32.totalorder %s326_s7, %s322_s6  ;;  %p60_p4 = scmp.eq.s32.totalorder %s184_s11, 1 }
   0x9   : > { %s384_s15 = scalar_select %p41_p1, %s330_s8, %s43_s13  }
   0xa   : > { %p386_p5 = por %p54_p2, %p53_p0  ;;  %p390_p6 = por %p60_p4, %p59_p3 }
   0xb   : > { %p185_p7 = scmp.ge.s32.totalorder %s334_s9, 1  ;;  %p67_p8 = scmp.lt.s32.totalorder %s334_s9, 3 }
   0xc   : > { %s451_s17 = scalar_select %p390_p6, 1, 0 }
   0xd   : > { %p208_p9 = scmp.eq.s32.totalorder %s369_s10, 0  ;;  %p397_p10 = pnand %p185_p7, %p67_p8 }
   0xe   : > { %s336_s19 = smov [#allocation2]  }
   0xf   : > { %s80_s20 = sshll.u32 %s336_s19, 4  ;;  %p200_p11 = pneg %p397_p10  ;;  %s81_s20 = int_to_ptr.vmem [resolvable:$true] %s80_s20 }
  0x10   : > { %s255_s21 = scalar_lea.vmem %s81_s20, 128  ;;  %p263_p3 = scmp.lt.s32.totalorder %s81_s20, %s81_s20 }
  0x11   : > { %p201_p12 = pnand %p208_p9, %p200_p11  ;;  %p256_p0 = scmp.ne.s32.totalorder %s81_s20, %s255_s21 }
  0x12   : > { %p264_p4 = scmp.lt.s32.totalorder %s255_s21, %s255_s21 }
  0x13   : > { %p246_p13 = pneg %p201_p12 }
  0x14   : > { %p265_p6 = por %p264_p4, %p263_p3 }
  0x15   : > { %p258_p1 = pnand %p256_p0, %p246_p13 }
  0x17   : > { %p259_p2 = pneg %p258_p1 }
  0x19   : > { %p266_p7 = pnand %p265_p6, %p259_p2 }
  0x1b   : > { %269 = shalt.err (!%p266_p7)
}
  0x1c   : > { %203 = dma.hbm_to_vmem [thread:$0]  (!%p201_p12), %s448_s0, 128, %s81_s20, [#allocation3]  }
  0x1d   : > { %93 = sbr.rel (%p397_p10) target bundleno = 60 (0x3c), region = 24 }
  0x22   : > { %313 = dma.done.wait (%p208_p9), [#allocation3], 128  }
  0x23   : > { %315 = vsyncadd (%p208_p9), [#allocation3], 4294967168  ;;  %s105_s24 = sand.u32 1, %s326_s7   ;;  %s191_s28 = sshll.u32 %s369_s10, 7  ;;  %v108_v0 = vld [vmem:[#allocation2] sm:$0xff] }
  0x24   : > { %s189_s25 = sshll.u32 %s105_s24, 3  ;;  %v109_v1 = vadd.f32 1.0, %v108_v0  ;;  %s123_s2 = scalar_lea.hbm %s449_s1, %s191_s28 }
  0x25   : > { %s107_s26 = scalar_lea.vmem [#allocation5], %s189_s25  ;;  %s112_s3 = scalar_lea.sflag [#allocation4], %s105_s24 }
  0x26   : > { %s125_s27 = sshll.u32 %s107_s26, 4  ;;  %110 = vst [vmem:[%s107_s26] sm:$0xff] %v109_v1  ;;  %s337_s5 = smov [#allocation5]   ;;  %s126_s27 = int_to_ptr.vmem [resolvable:$true] %s125_s27 }
  0x27   : > { %s270_s4 = scalar_lea.vmem %s126_s27, 128  ;;  %s274_s11 = sshll.u32 %s337_s5, 4  ;;  %s275_s11 = int_to_ptr.vmem [resolvable:$false] %s274_s11 }
  0x28   : > { %p271_p6 = scmp.ne.s32.totalorder %s126_s27, %s270_s4  ;;  %s276_s13 = scalar_lea.vmem %s275_s11, 256 }
  0x29   : > { %p277_p10 = scmp.lt.s32.totalorder %s126_s27, %s275_s11  ;;  %p278_p11 = scmp.lt.s32.totalorder %s276_s13, %s270_s4 }
  0x2a   : > { %p272_p8 = pnand %p271_p6, %p386_p5 }
  0x2b   : > { %p279_p12 = por %p278_p11, %p277_p10 }
  0x2c   : > { %p273_p9 = pneg %p272_p8 }
  0x2e   : > { %p280_p13 = pnand %p279_p12, %p273_p9 }
  0x30   : > { %283 = shalt.err (!%p280_p13)
}
  0x31   : > { %s284_s10 = scalar_lea.hbm %s123_s2, 128  ;;  %s288_s19 = scalar_lea.hbm %s449_s1, 256 }
  0x32   : > { %p285_p0 = scmp.ne.s32.totalorder %s123_s2, %s284_s10  ;;  %p289_p3 = scmp.lt.s32.totalorder %s123_s2, %s449_s1 }
  0x33   : > { %p290_p4 = scmp.lt.s32.totalorder %s288_s19, %s284_s10 }
  0x34   : > { %p286_p1 = pnand %p285_p0, %p386_p5 }
  0x35   : > { %p291_p7 = por %p290_p4, %p289_p3 }
  0x36   : > { %p287_p2 = pneg %p286_p1 }
  0x38   : > { %p292_p6 = pnand %p291_p7, %p287_p2 }
  0x3a   : > { %295 = shalt.err (!%p292_p6)
}
  0x3b   : > { %198 = dma.vmem_to_hbm [thread:$0]  (%p386_p5), %s126_s27, 128, %s123_s2, %s112_s3  }
  0x3c PF: > { %p210_p8 = scmp.ge.s32.totalorder %s334_s9, 2  ;;  %s137_s22 = sand.u32 1, %s322_s6  }
  0x3d   : > { %p453_p9 = scmp.ne.s32.totalorder %s451_s17, 0  ;;  %s138_s23 = scalar_lea.sflag [#allocation4], %s137_s22 }
  0x3f   : > { %p205_p10 = pnand %p210_p8, %p453_p9 }
  0x41   : > { %p206_p11 = pneg %p205_p10 }
  0x43   : > { %317 = dma.done.wait (%p206_p11), %s138_s23, 128  }
  0x44   : > { %319 = vsyncadd (%p206_p11), %s138_s23, 4294967168  ;;  %p12_p12 = scmp.ge.s32.totalorder %s373_s12, 4   ;;  %s454_s6 = smov %s326_s7 }
  0x45   : > { %s455_s7 = smov %s330_s8  ;;  %s456_s8 = smov %s384_s15 }
  0x46   : > { %s457_s9 = smov %s373_s12  ;;  %14 = sbr.rel (!%p12_p12) target bundleno = 4 (0x4), region = 61 }
  0x4b   :  { %143 = vsyncpa [#allocation3], 1 }
  0x4c   :  { %145 = vsyncpa [#allocation3 + $0x1], 1 }
  0x4d   :  { %146 = vsyncpa [#allocation4], 1 }
  0x4e   :  { %148 = vsyncpa [#allocation4 + $0x1], 1 }

// kernel: tpu_custom_call.1
= control target key start
LH: loop header
LB: loop body
LE: loop exit
PB: predicated region body
PF: predicated region fallthrough
CT: control target
= control target key end

     0   :  { %10 = vsyncpa [#allocation3], 0  ;;  %s705_s0 = inlined_call_operand.hbm [shape: f32[16,128], index: 0, kind: input, shape index: {}]   ;;  %s706_s1 = inlined_call_operand.hbm [shape: bf16[128,256], index: 1, kind: input, shape index: {}]   ;;  %s707_s2 = inlined_call_operand.vmem [shape: f32[1,256], index: 2, kind: input, shape index: {}]   ;;  %s708_s3 = inlined_call_operand.hbm [shape: bf16[256,128], index: 3, kind: input, shape index: {}]   ;;  %s709_s4 = inlined_call_operand.vmem [shape: f32[1,128], index: 4, kind: input, shape index: {}]   ;;  %s710_s5 = inlined_call_operand.hbm [shape: f32[16,128], index: 5, kind: output, shape index: {}]  }
   0x1   :  { %11 = vsyncpa [#allocation6], 0 }
   0x2   :  { %12 = vsyncpa [#allocation4], 0  ;;  %s636_s18 = smov [#allocation5]   ;;  %s637_s20 = smov [#allocation2]  }
   0x3   :  { %s30_s19 = sshll.u32 %s636_s18, 4  ;;  %s18_s21 = sshll.u32 %s637_s20, 4  ;;  %s31_s19 = int_to_ptr.vmem [resolvable:$true] %s30_s19  ;;  %s19_s21 = int_to_ptr.vmem [resolvable:$true] %s18_s21 }
   0x4   :  { %s558_s22 = scalar_lea.vmem %s31_s19, 2048  ;;  %p563_p1 = scmp.lt.s32.totalorder %s31_s19, %s31_s19 }
   0x5   :  { %p559_p0 = scmp.ne.s32.totalorder %s31_s19, %s558_s22  ;;  %p564_p2 = scmp.lt.s32.totalorder %s558_s22, %s558_s22 }
   0x7   :  { %p565_p3 = por %p564_p2, %p563_p1 }
   0x9   :  { %p566_p4 = pnand %p565_p3, %p559_p0 }
   0xb   :  { %569 = shalt.err (!%p566_p4)
}
   0xc   :  { %s638_s23 = smov 128   ;;  %s639_s24 = smov 8  }
   0xd   :  { %36 = dma.hbm_to_vmem [thread:$0]  %s706_s1, 2048, %s31_s19, [#allocation6], %s638_s23, %s638_s23, %s639_s24  }
   0xe   :  { %s578_s27 = scalar_lea.vmem %s19_s21, 256  ;;  %p583_p6 = scmp.lt.s32.totalorder %s19_s21, %s19_s21 }
   0xf   :  { %p579_p5 = scmp.ne.s32.totalorder %s19_s21, %s578_s27  ;;  %p584_p7 = scmp.lt.s32.totalorder %s578_s27, %s578_s27 }
  0x11   :  { %p585_p8 = por %p584_p7, %p583_p6 }
  0x13   :  { %p586_p9 = pnand %p585_p8, %p579_p5 }
  0x15   :  { %589 = shalt.err (!%p586_p9)
}
  0x16   :  { %24 = dma.hbm_to_vmem [thread:$0]  %s705_s0, 256, %s19_s21, [#allocation3], %s638_s23, %s638_s23, %s639_s24  }
  0x17   :  { %s640_s30 = smov [#allocation7]  }
  0x18   :  { %s44_s6 = sshll.u32 %s640_s30, 4  ;;  %s45_s6 = int_to_ptr.vmem [resolvable:$true] %s44_s6 }
  0x19   :  { %s598_s7 = scalar_lea.vmem %s45_s6, 2048  ;;  %p603_p11 = scmp.lt.s32.totalorder %s45_s6, %s45_s6 }
  0x1a   :  { %p599_p10 = scmp.ne.s32.totalorder %s45_s6, %s598_s7  ;;  %p604_p12 = scmp.lt.s32.totalorder %s598_s7, %s598_s7 }
  0x1c   :  { %p605_p13 = por %p604_p12, %p603_p11 }
  0x1e   :  { %p606_p0 = pnand %p605_p13, %p599_p10 }
  0x20   :  { %609 = shalt.err (!%p606_p0)
}
  0x21   :  { %s641_s1 = smov 64   ;;  %s642_s8 = smov 4  }
  0x22   :  { %50 = dma.hbm_to_vmem [thread:$0]  %s708_s3, 2048, %s45_s6, [#allocation6], %s641_s1, %s641_s1, %s642_s8  }
  0x23   :  { %630 = dma.done.wait [#allocation3], 256  }
  0x24   :  { %631 = vsyncadd [#allocation3], 4294967040 }
  0x25   :  { %632 = dma.done.wait [#allocation6], 4096  }
  0x26   :  { %633 = vsyncadd [#allocation6], 4294963200  ;;  %v643_v0 = vmov 0   ;;  %v506_v1 = vld [vmem:[#allocation5 + $0x74] ss:$8 sps:$4 sm:$0xff]   ;;  %v534_v16 = vld [vmem:[#allocation7 + $0x68] sm:$0xff]   ;;  %v84_v36 = vlaneseq }
  0x27   :  { %206 = vmatprep.mubr.bf16.mxu0 %v643_v0  ;;  %v508_v2 = vld [vmem:[#allocation5 + $0x70] ss:$8 sps:$4 sm:$0xff]   ;;  %174 = vmatprep.subr.bf16.mxu0 %v506_v1  ;;  %v509_v3 = vld [vmem:[#allocation5 + $0x64] ss:$8 sps:$4 sm:$0xff]   ;;  %v511_v4 = vld [vmem:[#allocation5 + $0x60] ss:$8 sps:$4 sm:$0xff]  }
  0x28   :  { %175 = vmatpush1.bf16.msra.mxu0 %v508_v2  ;;  %v512_v5 = vld [vmem:[#allocation5 + $0x54] ss:$8 sps:$4 sm:$0xff]   ;;  %v514_v6 = vld [vmem:[#allocation5 + $0x50] ss:$8 sps:$4 sm:$0xff]   ;;  %v515_v7 = vld [vmem:[#allocation5 + $0x44] ss:$8 sps:$4 sm:$0xff]  }
  0x29   :  { %176 = vmatprep.subr.bf16.mxu0 %v509_v3  ;;  %v517_v8 = vld [vmem:[#allocation5 + $0x40] ss:$8 sps:$4 sm:$0xff]   ;;  %v518_v9 = vld [vmem:[#allocation5 + $0x34] ss:$8 sps:$4 sm:$0xff]   ;;  %v520_v11 = vld [vmem:[#allocation5 + $0x30] ss:$8 sps:$4 sm:$0xff]  }
  0x2a   :  { %v530_v10 = vld [vmem:[#allocation7 + $0x78] sm:$0xff]   ;;  %v521_v13 = vld [vmem:[#allocation5 + $0x24] ss:$8 sps:$4 sm:$0xff]   ;;  %v532_v14 = vld [vmem:[#allocation7 + $0x70] sm:$0xff]   ;;  %v85_v37 = vshrl.u32 %v84_v36, 7 }
  0x2b   :  { %v531_v12 = vld [vmem:[#allocation7 + $0x38] sm:$0xff]   ;;  %475 = vmatprep.subr.bf16.mxu1 %v530_v10  ;;  %v533_v15 = vld [vmem:[#allocation7 + $0x30] sm:$0xff]   ;;  %v523_v17 = vld [vmem:[#allocation5 + $0x20] ss:$8 sps:$4 sm:$0xff]  }
  0x2c   :  { %177 = vmatpush1.bf16.msra.mxu0 %v511_v4  ;;  %476 = vmatpush3.bf16.msra.mxu1 %v531_v12  ;;  %v524_v18 = vld [vmem:[#allocation5 + $0x14] ss:$8 sps:$4 sm:$0xff]   ;;  %v535_v19 = vld [vmem:[#allocation7 + $0x28] sm:$0xff]   ;;  %v536_v20 = vld [vmem:[#allocation7 + $0x60] sm:$0xff]   ;;  %v86_v38 = vsub.s32 0, %v85_v37  ;;  %v90_v40 = vsub.s32 1, %v85_v37 }
  0x2d   :  { %178 = vmatprep.subr.bf16.mxu0 %v512_v5  ;;  %477 = vmatprep.subr.bf16.mxu1 %v532_v14  ;;  %v526_v21 = vld [vmem:[#allocation5 + $0x10] ss:$8 sps:$4 sm:$0xff]   ;;  %v537_v22 = vld [vmem:[#allocation7 + $0x20] sm:$0xff]   ;;  %v542_v32 = vld [vmem:[#allocation7 + $0x48] sm:$0xff]  }
  0x2e   :  { %v527_v23 = vld [vmem:[#allocation5 + $0x4] ss:$8 sps:$4 sm:$0xff]   ;;  %v538_v24 = vld [vmem:[#allocation7 + $0x58] sm:$0xff]   ;;  %v529_v25 = vld [vmem:[#allocation5] ss:$8 sps:$4 sm:$0xff]  }
  0x2f   :  { %v63_v26 = vld [vmem:[#allocation2] sm:$0xff]  ;;  %v64_v27 = vld [vmem:[#allocation2 + $0x8] sm:$0xff]  ;;  %v543_v33 = vld [vmem:[#allocation7 + $0x8] sm:$0xff]  }
  0x30   :  { %179 = vmatpush1.bf16.msra.mxu0 %v514_v6  ;;  %478 = vmatpush3.bf16.msra.mxu1 %v533_v15  ;;  %v539_v28 = vld [vmem:[#allocation7 + $0x18] sm:$0xff]   ;;  %v65_v29 = vpack.c.bf16 %v64_v27, %v63_v26  ;;  %v540_v30 = vld [vmem:[#allocation7 + $0x50] sm:$0xff]   ;;  %v544_v34 = vld [vmem:[#allocation7 + $0x40] sm:$0xff]  }
  0x31   :  { %180 = vmatprep.subr.bf16.mxu0 %v515_v7  ;;  %479 = vmatprep.subr.bf16.mxu1 %v534_v16  ;;  %v541_v31 = vld [vmem:[#allocation7 + $0x10] sm:$0xff]   ;;  %v545_v35 = vld [vmem:[#allocation7] sm:$0xff]  }
  0x32   :  { %v82_v39 = vld [vmem:[%s707_s2] sm:$0x3] }
  0x33   :  { %v87_v42 = vrot.slane %v82_v39, %v86_v38  ;;  %v91_v44 = vrot.slane %v82_v39, %v90_v40  ;;  %v458_v56 = vld [vmem:[%s709_s4] ss:$0 sm:$0xff]  ;;  %s644_s4 = smov [#allocation8]  }
  0x34   :  { %181 = vmatpush1.bf16.msra.mxu0 %v517_v8  ;;  %480 = vmatpush3.bf16.msra.mxu1 %v535_v19  ;;  %s429_s12 = sshll.u32 %s644_s4, 4  ;;  %s430_s12 = int_to_ptr.vmem [resolvable:$true] %s429_s12 }
  0x35   :  { %182 = vmatprep.subr.bf16.mxu0 %v518_v9  ;;  %481 = vmatprep.subr.bf16.mxu1 %v536_v20  ;;  %s610_s13 = scalar_lea.vmem %s430_s12, 256  ;;  %p615_p2 = scmp.lt.s32.totalorder %s430_s12, %s430_s12 }
  0x36   :  { %p611_p1 = scmp.ne.s32.totalorder %s430_s12, %s610_s13  ;;  %p616_p3 = scmp.lt.s32.totalorder %s610_s13, %s610_s13 }
  0x38   :  { %183 = vmatpush1.bf16.msra.mxu0 %v520_v11  ;;  %482 = vmatpush3.bf16.msra.mxu1 %v537_v22  ;;  %p617_p4 = por %p616_p3, %p615_p2 }
  0x39   :  { %184 = vmatprep.subr.bf16.mxu0 %v521_v13  ;;  %483 = vmatprep.subr.bf16.mxu1 %v538_v24 }
  0x3a   :  { %p618_p5 = pnand %p617_p4, %p611_p1 }
  0x3c   :  { %185 = vmatpush1.bf16.msra.mxu0 %v523_v17  ;;  %484 = vmatpush3.bf16.msra.mxu1 %v539_v28 }
  0x3d   :  { %186 = vmatprep.subr.bf16.mxu0 %v524_v18  ;;  %485 = vmatprep.subr.bf16.mxu1 %v540_v30 }
  0x40   :  { %187 = vmatpush1.bf16.msra.mxu0 %v526_v21  ;;  %486 = vmatpush3.bf16.msra.mxu1 %v541_v31 }
  0x41   :  { %188 = vmatprep.subr.bf16.mxu0 %v527_v23  ;;  %487 = vmatprep.subr.bf16.mxu1 %v542_v32 }
  0x44   :  { %189 = vmatpush1.bf16.msra.mxu0 %v529_v25  ;;  %488 = vmatpush3.bf16.msra.mxu1 %v543_v33 }
  0x45   :  { %489 = vmatprep.subr.bf16.mxu1 %v544_v34 }
  0x47   :  { %207 = vmatmul.mubr.bf16.vlgmr.msra.gmra.mxu0 %v65_v29 }
  0x48   :  { %490 = vmatpush3.bf16.msra.mxu1 %v545_v35 }
 0x107   :  { %v208_v41 = vpop.f32.mrf.mxu0 }
 0x108   :  { %v209_v47 = vadd.f32 %v208_v41, %v87_v42 }
 0x109   :  { %v210_v43 = vpop.f32.mrf.mxu0 }
 0x10a   :  { %v211_v49 = vadd.f32 %v210_v43, %v91_v44 }
 0x10b   :  { %v212_v45 = vpop.f32.mrf.mxu0 }
 0x10c   :  { %v213_v46 = vadd.f32 %v212_v45, %v87_v42 }
 0x10d   :  { %v214_v48 = vpop.f32.mrf.mxu0 }
 0x10e   :  { %v215_v50 = vadd.f32 %v214_v48, %v91_v44  ;;  %v217_v51 = vpack.c.bf16 %v213_v46, %v209_v47 }
 0x110   :  { %v218_v52 = vpack.c.bf16 %v215_v50, %v211_v49  ;;  %v219_v54 = vmax.bf16 %v643_v0, %v217_v51 }
 0x112   :  { %v220_v53 = vmax.bf16 %v643_v0, %v218_v52 }
 0x114   :  { %388 = vmatprep.mubr.bf16.mxu1 %v220_v53 }
 0x115   :  { %389 = vmatmul.mubr.bf16.vlgmr.msra.gmra.mxu1 %v219_v54 }
 0x1d5   :  { %v491_v55 = vpop.f32.mrf.mxu1 }
 0x1d7   :  { %v492_v57 = vpop.f32.mrf.mxu1 }
 0x1d8   :  { %v493_v58 = vadd.f32 %v492_v57, %v491_v55 }
 0x1d9   :  { %v494_v59 = vpop.f32.mrf.mxu1 }
 0x1da   :  { %v391_v60 = vadd.f32 %v493_v58, %v458_v56 }
 0x1db   :  { %v495_v61 = vpop.f32.mrf.mxu1 }
 0x1dc   :  { %v496_v62 = vadd.f32 %v495_v61, %v494_v59  ;;  %v397_v63 = vadd.f32 %v391_v60, %v63_v26 }
 0x1de   :  { %v394_v1 = vadd.f32 %v496_v62, %v458_v56  ;;  %399 = vadd.xlane.f32.xlu0 %v397_v63 }
 0x1e0   :  { %v398_v2 = vadd.f32 %v394_v1, %v64_v27 }
 0x1e2   :  { %401 = vadd.xlane.f32.xlu0 %v398_v2 }
 0x267   :  { %v400_v3 = vpop.xlane.xlu0 %399 }
 0x268   :  { %v404_v0 = vmul.f32 0.0078125, %v400_v3 }
 0x26a   :  { %v406_v4 = vsub.f32 %v397_v63, %v404_v0 }
 0x26b   :  { %v402_v5 = vpop.xlane.xlu0 %401 }
 0x26c   :  { %v405_v6 = vmul.f32 0.0078125, %v402_v5  ;;  %v408_v7 = vmul.f32 %v406_v4, %v406_v4 }
 0x26e   :  { %v407_v8 = vsub.f32 %v398_v2, %v405_v6  ;;  %410 = vadd.xlane.f32.xlu1 %v408_v7 }
 0x270   :  { %v409_v9 = vmul.f32 %v407_v8, %v407_v8 }
 0x272   :  { %412 = vadd.xlane.f32.xlu1 %v409_v9 }
 0x2f7   :  { %v411_v10 = vpop.xlane.xlu1 %410 }
 0x2f8   :  { %v414_v11 = vmul.f32 0.0078125, %v411_v10 }
 0x2fa   :  { %v416_v12 = vadd.f32 1e-05, %v414_v11 }
 0x2fb   :  { %v413_v13 = vpop.xlane.xlu1 %412 }
 0x2fc   :  { %546 = vrsqrt.f32 %v416_v12  ;;  %v415_v14 = vmul.f32 0.0078125, %v413_v13 }
 0x2fe   :  { %v417_v15 = vadd.f32 1e-05, %v415_v14 }
 0x300   :  { %548 = vrsqrt.f32 %v417_v15 }
 0x309   :  { %v547_v16 = vpop.eup %546 }
 0x30a   :  { %v420_v17 = vmul.f32 %v547_v16, %v406_v4 }
 0x30c   :  { %422 = vst [vmem:[#allocation8] sm:$0xff] %v420_v17 }
 0x30d   :  { %v549_v18 = vpop.eup %548 }
 0x30e   :  { %v421_v19 = vmul.f32 %v549_v18, %v407_v8 }
 0x310   :  { %423 = vst [vmem:[#allocation8 + $0x8] sm:$0xff] %v421_v19 }
 0x311   :  { %621 = shalt.err (!%p618_p5)
}
 0x312   :  { %435 = dma.vmem_to_hbm [thread:$0]  %s430_s12, 256, %s710_s5, [#allocation4], %s638_s23, %s638_s23, %s639_s24  }
 0x313   :  { %634 = dma.done.wait [#allocation4], 256  }
 0x314   :  { %635 = vsyncadd [#allocation4], 4294967040 }
 0x315   :  { %439 = vsyncpa [#allocation3], 1 }
 0x316   :  { %440 = vsyncpa [#allocation6], 1 }
 0x317   :  { %441 = vsyncpa [#allocation4], 1 }

</bundles_post_ra>
